<compile_context>
chip_gen: v7x
topology: tpu7x:2x2x1
jax: 0.10.0
libtpu: 0.0.40
codegen_flags: <defaults>
</compile_context>

<pallas_src>
import functools

import jax
import jax.numpy as jnp
import numpy as np
from jax.experimental import pallas as pl
from jax.experimental.pallas import tpu as pltpu


def _round_up(x, m):
    return ((x + m - 1) // m) * m


# --------------------------------------------------------------------------
# Kernel: per-query-tile logits + cross-entropy, reduced to one f32 per block.
# --------------------------------------------------------------------------
def _proto_ce_kernel(q_ref, lbl_ref, p_ref, pp_ref, out_ref, *, n_query, block_q):
    # q_ref  : (TQ, D)   bf16  pipelined query tile
    # lbl_ref: (TQ, 1)   int32 pipelined label tile
    # p_ref  : (NWP, D)  bf16  resident prototypes, pre-scaled by 2/T, class-padded with 0
    # pp_ref : (1, NWP)  f32   resident ||p||^2 / T, padded classes carry +1e30
    nwp = pp_ref.shape[1]

    # MXU: (2/T) * q . p, contracting on D directly (no transpose / relayout).
    qp = jax.lax.dot_general(
        q_ref[...], p_ref[...],
        dimension_numbers=(((1,), (1,)), ((), ())),
        preferred_element_type=jnp.float32)                       # (TQ, NWP) f32

    # logits = (2 q.p - ||p||^2) / T  (the per-row ||q||^2/T constant cancels
    # in lse - picked, so it is never computed).  Padded classes end up at
    # ~ -1e30 because pp carries +1e30 there -> they vanish in the softmax.
    logits = qp - pp_ref[...]                                      # (TQ, NWP)

    # Numerically stable log-sum-exp, intermediates kept 2-D.
    m = jnp.max(logits, axis=1, keepdims=True)                     # (TQ, 1)
    lse = m + jnp.log(jnp.sum(jnp.exp(logits - m), axis=1, keepdims=True))

    # Pick the true-class logit via a one-hot mask (labels are < n_way, so the
    # -1e30 padded columns are multiplied by exactly 0).
    class_ids = jax.lax.broadcasted_iota(jnp.int32, (block_q, nwp), 1)
    onehot = (class_ids == lbl_ref[...]).astype(jnp.float32)       # (TQ, NWP)
    picked = jnp.sum(logits * onehot, axis=1, keepdims=True)       # (TQ, 1)

    # Mask padded query rows, then reduce to a single per-block partial sum.
    row = (pl.program_id(0) * block_q
           + jax.lax.broadcasted_iota(jnp.int32, (block_q, 1), 0))
    per_query = jnp.where(row < n_query, lse - picked, 0.0)        # (TQ, 1)
    out_ref[...] = jnp.sum(per_query, axis=0, keepdims=True).reshape(1, 1, 1)


# --------------------------------------------------------------------------
# Tile sizing: budget includes double-buffered bf16 q tiles, lane-padded label
# tiles and ~6 (TQ, NWP) f32 body temporaries; residents are counted separately.
# --------------------------------------------------------------------------
def _choose_block_q(n_query, d, nwp, block_q):
    per_row = 2 * d * 2 + 2 * 128 * 4 + 6 * nwp * 4      # bytes of VMEM per query row
    budget = 12 * 1024 * 1024                            # conservative even for v5e/v7x
    cap = max(8, (budget // per_row) // 8 * 8)
    tq = min(_round_up(max(block_q, 8), 8), _round_up(n_query, 8), cap, 2048)
    # v7x megacore: make sure the "parallel" grid has >= 2 blocks when possible.
    if n_query > 8:
        tq = min(tq, _round_up((n_query + 1) // 2, 8))
    # v6e/v7x MXU cadence: large tiles on 256-row boundaries (classes stay at 128).
    if tq >= 256:
        tq = (tq // 256) * 256
    return max(tq, 8)


# --------------------------------------------------------------------------
# Wrapper
# --------------------------------------------------------------------------
def prototypical_loss(query_features, support_features, support_labels,
                      query_labels, temperature=1.0, block_q=512):
    """JAX/Pallas equivalent of PrototypicalLoss.forward.

    support_labels is host metadata only (exactly like the PyTorch module,
    which only uses it to derive n_way / n_shot).  support_features must be
    shot-major (row = shot * n_way + way), same implicit contract as the
    PyTorch .view(n_shot, n_way, -1).
    """
    support_labels_np = np.asarray(support_labels)
    n_way = int(np.unique(support_labels_np).size)
    n_shot = int(support_labels_np.shape[0]) // n_way
    # TODO(synk): the shot-major layout of support_features is an implicit
    # contract (identical to the PyTorch .view); it is not re-checked here.

    q = jnp.asarray(query_features, dtype=jnp.float32)
    s = jnp.asarray(support_features, dtype=jnp.float32)
    lbl = jnp.asarray(query_labels, dtype=jnp.int32).reshape(-1, 1)

    nq, d = q.shape
    nwp = _round_up(max(n_way, 128), 128)          # lane-dense class dimension
    inv_t = 1.0 / float(temperature)

    # Prototypes (tiny: n_shot x n_way x D) in plain XLA -- no second kernel.
    protos = jnp.mean(s.reshape(n_shot, n_way, d), axis=0)              # (n_way, D) f32
    # Fold temperature + padded-class mask into the residents:
    #   logits = (2/T) q.p - ||p||^2/T ; padded classes get ||p||^2/T = +1e30.
    pp = jnp.sum(protos * protos, axis=1, keepdims=True).T * inv_t      # (1, n_way)
    pp_row = jnp.pad(pp, ((0, 0), (0, nwp - n_way)), constant_values=1e30)
    protos_scaled = jnp.pad(protos * (2.0 * inv_t), ((0, nwp - n_way), (0, 0)))
    protos_bf16 = protos_scaled.astype(jnp.bfloat16)                    # bf16 MXU stream

    tq = _choose_block_q(nq, d, nwp, block_q)
    nq_pad = _round_up(nq, tq)
    n_blocks = nq_pad // tq

    q_bf16 = jnp.pad(q, ((0, nq_pad - nq), (0, 0))).astype(jnp.bfloat16)
    lbl_pad = jnp.pad(lbl, ((0, nq_pad - nq), (0, 0)))

    # Explicit scoped-VMEM limit that actually covers tiles + temporaries +
    # residents (safe on v5e's 16 MiB default scope and v7x's 64 MiB physical).
    vmem_need = (2 * tq * d * 2            # double-buffered bf16 q tiles
                 + 2 * tq * 128 * 4        # lane-padded label tiles
                 + 6 * tq * nwp * 4        # (TQ, NWP) f32 body temporaries
                 + nwp * d * 2             # resident prototypes (single copy)
                 + 8 * nwp * 4             # resident ||p||^2 row
                 + 2 * 8 * 128 * 4)        # per-block scalar outputs
    vmem_limit = int(min(32 * 1024 * 1024, max(16 * 1024 * 1024, 2 * vmem_need)))

    kernel = functools.partial(_proto_ce_kernel, n_query=nq, block_q=tq)

    per_block = pl.pallas_call(
        kernel,
        out_shape=jax.ShapeDtypeStruct((n_blocks, 1, 1), jnp.float32),
        grid_spec=pltpu.PrefetchScalarGridSpec(
            num_scalar_prefetch=0,
            grid=(n_blocks,),
            in_specs=[
                pl.BlockSpec((tq, d), lambda i: (i, 0)),   # query tile (pipelined, bf16)
                pl.BlockSpec((tq, 1), lambda i: (i, 0)),   # labels tile
                pl.BlockSpec(memory_space=pltpu.MemorySpace.VMEM),  # prototypes (resident)
                pl.BlockSpec(memory_space=pltpu.MemorySpace.VMEM),  # ||p||^2/T (resident)
            ],
            out_specs=pl.BlockSpec((1, 1, 1), lambda i: (i, 0, 0)),
        ),
        compiler_params=pltpu.CompilerParams(
            dimension_semantics=("parallel",),
            vmem_limit_bytes=vmem_limit),
    )(q_bf16, lbl_pad, protos_bf16, pp_row)

    # Final mean over the *real* queries (padded rows contributed exactly 0).
    return jnp.sum(per_block) * (1.0 / nq)


# --------------------------------------------------------------------------
# Pure-JAX references mirroring the PyTorch code.
# --------------------------------------------------------------------------
def _reference_loss(query_features, support_features, support_labels,
                    query_labels, temperature=1.0, quantize_like_kernel=False):
    labels_np = np.asarray(support_labels)
    n_way = int(np.unique(labels_np).size)
    n_shot = labels_np.shape[0] // n_way
    q = jnp.asarray(query_features, jnp.float32)
    s = jnp.asarray(support_features, jnp.float32)
    lbl = jnp.asarray(query_labels, jnp.int32)
    protos = jnp.mean(s.reshape(n_shot, n_way, -1), axis=0)
    if quantize_like_kernel:
        # Same math/quantization as the kernel: bf16 q and bf16 (2/T)-scaled
        # prototypes into a f32-accumulated matmul; the ||q||^2 row constant
        # is dropped (it cancels in lse - picked).
        inv_t = 1.0 / temperature
        p_s = (protos * (2.0 * inv_t)).astype(jnp.bfloat16).astype(jnp.float32)
        q_b = q.astype(jnp.bfloat16).astype(jnp.float32)
        pp = jnp.sum(protos * protos, axis=1) * inv_t
        logits = q_b @ p_s.T - pp[None, :]
    else:
        diff = q[:, None, :] - protos[None, :, :]
        logits = -jnp.sum(diff * diff, axis=-1) / temperature
    logz = jax.scipy.special.logsumexp(logits, axis=1)
    picked = jnp.take_along_axis(logits, lbl[:, None], axis=1)[:, 0]
    return jnp.mean(logz - picked)


if __name__ == "__main__":
    key = jax.random.PRNGKey(0)

    def run_case(n_way, n_shot, n_query_per_way, d, temperature, block_q, case_key):
        n_support = n_way * n_shot
        n_query = n_way * n_query_per_way
        k1, k2 = jax.random.split(case_key)
        query_features = jax.random.normal(k1, (n_query, d), dtype=jnp.float32)
        support_features = jax.random.normal(k2, (n_support, d), dtype=jnp.float32)
        # shot-major support labels: [0..n_way-1, 0..n_way-1, ...]
        support_labels = np.tile(np.arange(n_way, dtype=np.int32), n_shot)
        query_labels = np.repeat(np.arange(n_way, dtype=np.int32), n_query_per_way)

        loss = prototypical_loss(query_features, support_features,
                                 support_labels, query_labels,
                                 temperature=temperature, block_q=block_q)
        loss = jax.block_until_ready(loss)

        ref_q = _reference_loss(query_features, support_features, support_labels,
                                query_labels, temperature, quantize_like_kernel=True)
        ref_f32 = _reference_loss(query_features, support_features, support_labels,
                                  query_labels, temperature, quantize_like_kernel=False)
        # Tight check against the bf16-quantized reference (same math path).
        np.testing.assert_allclose(np.asarray(loss), np.asarray(ref_q),
                                   rtol=5e-3, atol=5e-3)
        # Loose check against the exact f32 reference (bf16 streaming drift only).
        np.testing.assert_allclose(np.asarray(loss), np.asarray(ref_f32),
                                   rtol=5e-2, atol=5e-2)

    k1, k2, k3 = jax.random.split(key, 3)
    run_case(4, 2, 3, 128, 2.0, 8, k1)      # tiny: 2 blocks of 8, padded query rows
    run_case(4, 2, 3, 128, 2.0, 512, k2)    # tiny: default tiling still splits in 2
    run_case(5, 3, 20, 256, 1.0, 512, k3)   # larger: multi-block, padded class cols

    print("KERNEL_OK")
</pallas_src>

<mosaic_0001>
module attributes {stable_mosaic.version = 11 : i64} {
  func.func @_proto_ce_kernel(%arg0: i32, %arg1: memref<8x128xbf16, #tpu.memory_space<vmem>>, %arg2: memref<8x1xi32, #tpu.memory_space<vmem>>, %arg3: memref<128x128xbf16, #tpu.memory_space<vmem>>, %arg4: memref<1x128xf32, #tpu.memory_space<vmem>>, %arg5: memref<1x1x1xf32, #tpu.memory_space<vmem>>) attributes {dimension_semantics = [#tpu.dimension_semantics<parallel>], iteration_bounds = array<i64: 2>, scalar_prefetch = 0 : i64, scratch_operands = 0 : i64, tpu.core_type = #tpu.core_type<tc>, window_params = [{transform_indices = @transform_0, window_bounds = array<i64: 8, 128>}, {transform_indices = @transform_1, window_bounds = array<i64: 8, 1>}, {pipeline_mode = #tpu.pipeline_mode<synchronous>, transform_indices = @transform_2, window_bounds = array<i64: 128, 128>}, {pipeline_mode = #tpu.pipeline_mode<synchronous>, transform_indices = @transform_3, window_bounds = array<i64: 1, 128>}, {transform_indices = @transform_4, window_bounds = array<i64: 1, 1, 1>}]} {
    %c0 = arith.constant 0 : index
    %c0_0 = arith.constant 0 : index
    %0 = vector.load %arg1[%c0, %c0_0] : memref<8x128xbf16, #tpu.memory_space<vmem>>, vector<8x128xbf16>
    %c0_1 = arith.constant 0 : index
    %c0_2 = arith.constant 0 : index
    %1 = vector.load %arg3[%c0_1, %c0_2] : memref<128x128xbf16, #tpu.memory_space<vmem>>, vector<128x128xbf16>
    %cst = arith.constant dense<0.000000e+00> : vector<8x128xf32>
    %2 = tpu.matmul %0, %1, %cst {dimension_numbers = #tpu.dot_dimension_numbers<[1], [1], [0], [0], [0, 0, 1, 0], [], []>} : vector<8x128xbf16>, vector<128x128xbf16>, vector<8x128xf32> -> vector<8x128xf32>
    %c0_3 = arith.constant 0 : index
    %c0_4 = arith.constant 0 : index
    %3 = vector.load %arg4[%c0_3, %c0_4] : memref<1x128xf32, #tpu.memory_space<vmem>>, vector<1x128xf32>
    %4 = vector.broadcast %3 : vector<1x128xf32> to vector<8x128xf32>
    %5 = arith.subf %2, %4 : vector<8x128xf32>
    %cst_5 = arith.constant dense<0xFF800000> : vector<8xf32>
    %6 = vector.multi_reduction <maximumf>, %5, %cst_5 [1] : vector<8x128xf32> to vector<8xf32>
    %7 = vector.shape_cast %6 : vector<8xf32> to vector<8x1xf32>
    %8 = vector.broadcast %7 : vector<8x1xf32> to vector<8x128xf32>
    %9 = arith.subf %5, %8 : vector<8x128xf32>
    %10 = math.exp %9 : vector<8x128xf32>
    %cst_6 = arith.constant dense<0.000000e+00> : vector<8xf32>
    %11 = vector.multi_reduction <add>, %10, %cst_6 [1] : vector<8x128xf32> to vector<8xf32>
    %12 = vector.shape_cast %11 : vector<8xf32> to vector<8x1xf32>
    %13 = math.log %12 : vector<8x1xf32>
    %14 = arith.addf %7, %13 : vector<8x1xf32>
    %15 = tpu.iota {dimensions = array<i32: 1>} : vector<8x128xi32>
    %c0_7 = arith.constant 0 : index
    %c0_8 = arith.constant 0 : index
    %16 = vector.load %arg2[%c0_7, %c0_8] : memref<8x1xi32, #tpu.memory_space<vmem>>, vector<8x1xi32>
    %17 = vector.broadcast %16 : vector<8x1xi32> to vector<8x128xi32>
    %18 = arith.cmpi eq, %15, %17 : vector<8x128xi32>
    %19 = arith.extui %18 : vector<8x128xi1> to vector<8x128xi32>
    %20 = arith.sitofp %19 : vector<8x128xi32> to vector<8x128xf32>
    %21 = arith.mulf %5, %20 : vector<8x128xf32>
    %cst_9 = arith.constant dense<0.000000e+00> : vector<8xf32>
    %22 = vector.multi_reduction <add>, %21, %cst_9 [1] : vector<8x128xf32> to vector<8xf32>
    %23 = vector.shape_cast %22 : vector<8xf32> to vector<8x1xf32>
    %c8_i32 = arith.constant 8 : i32
    %24 = arith.muli %arg0, %c8_i32 : i32
    %25 = tpu.iota {dimensions = array<i32: 0>} : vector<8x1xi32>
    %26 = vector.broadcast %24 : i32 to vector<8x1xi32>
    %27 = arith.addi %26, %25 : vector<8x1xi32>
    %c12_i32 = arith.constant 12 : i32
    %28 = vector.broadcast %c12_i32 : i32 to vector<8x1xi32>
    %29 = arith.cmpi slt, %27, %28 : vector<8x1xi32>
    %30 = arith.subf %14, %23 : vector<8x1xf32>
    %cst_10 = arith.constant 0.000000e+00 : f32
    %31 = vector.broadcast %cst_10 : f32 to vector<8x1xf32>
    %32 = arith.select %29, %30, %31 : vector<8x1xi1>, vector<8x1xf32>
    %cst_11 = arith.constant dense<0.000000e+00> : vector<1xf32>
    %33 = vector.multi_reduction <add>, %32, %cst_11 [0] : vector<8x1xf32> to vector<1xf32>
    %34 = vector.shape_cast %33 : vector<1xf32> to vector<1x1xf32>
    %35 = vector.shape_cast %34 : vector<1x1xf32> to vector<1x1x1xf32>
    %c0_12 = arith.constant 0 : index
    %c0_13 = arith.constant 0 : index
    %c0_14 = arith.constant 0 : index
    %36 = vector.load %arg5[%c0_12, %c0_13, %c0_14] : memref<1x1x1xf32, #tpu.memory_space<vmem>>, vector<1x1x1xf32>
    tpu.vector_store %arg5[%c0_12, %c0_13, %c0_14], %35 {strides = array<i32>} : memref<1x1x1xf32, #tpu.memory_space<vmem>>, vector<1x1x1xf32>,
    return
  }
  func.func @transform_0(%arg0: i32) -> (i32, i32) {
    %c0_i32 = arith.constant 0 : i32
    %c0_i32_0 = arith.constant 0 : i32
    return %arg0, %c0_i32 : i32, i32
  }
  func.func @transform_1(%arg0: i32) -> (i32, i32) {
    %c0_i32 = arith.constant 0 : i32
    %c0_i32_0 = arith.constant 0 : i32
    return %arg0, %c0_i32 : i32, i32
  }
  func.func @transform_2(%arg0: i32) -> (i32, i32) {
    %c0_i32 = arith.constant 0 : i32
    %c0_i32_0 = arith.constant 0 : i32
    %c0_i32_1 = arith.constant 0 : i32
    return %c0_i32, %c0_i32_0 : i32, i32
  }
  func.func @transform_3(%arg0: i32) -> (i32, i32) {
    %c0_i32 = arith.constant 0 : i32
    %c0_i32_0 = arith.constant 0 : i32
    %c0_i32_1 = arith.constant 0 : i32
    return %c0_i32, %c0_i32_0 : i32, i32
  }
  func.func @transform_4(%arg0: i32) -> (i32, i32, i32) {
    %c0_i32 = arith.constant 0 : i32
    %c0_i32_0 = arith.constant 0 : i32
    %c0_i32_1 = arith.constant 0 : i32
    return %arg0, %c0_i32, %c0_i32_0 : i32, i32, i32
  }
}

</mosaic_0001>

<bundles_post_ra>
// kernel: tpu_custom_call.1
= control target key start
LH: loop header
LB: loop body
LE: loop exit
PB: predicated region body
PF: predicated region fallthrough
CT: control target
= control target key end

     0   :  { %9 = vsyncpa [#allocation3], 0  ;;  %s605_s15 = smov 0   ;;  %s673_s0 = inlined_call_operand.vmem [shape: bf16[16,128], index: 0, kind: input, shape index: {}]   ;;  %s674_s1 = inlined_call_operand.vmem [shape: s32[16,1], index: 1, kind: input, shape index: {}]   ;;  %s675_s2 = inlined_call_operand.hbm [shape: bf16[128,128], index: 2, kind: input, shape index: {}]   ;;  %s676_s3 = inlined_call_operand.vmem [shape: f32[1,128], index: 3, kind: input, shape index: {}]   ;;  %s677_s4 = inlined_call_operand.vmem [shape: f32[2,1,1], index: 4, kind: output, shape index: {}]  }
   0x1 LB: > { %s611_s16 = sadd.s32 4294967295, %s572_s15   ;;  %p448_p0 = scmp.ge.s32.totalorder %s572_s15, 1  ;;  %s572_s15 = sphi %s605_s15, %s15_s15  }
   0x2   : > { %p140_p1 = scmp.lt.s32.totalorder %s572_s15, 3  ;;  %s574_s17 = smov [#allocation2]  }
   0x3   : > { %s152_s18 = sshll.u32 %s574_s17, 4  ;;  %p678_p3 = scmp.eq.s32.totalorder %s611_s16, 0  ;;  %s153_s18 = int_to_ptr.vmem [resolvable:$true] %s152_s18 }
   0x4   : > { %p615_p2 = pnand %p448_p0, %p140_p1  ;;  %s534_s23 = scalar_lea.hbm %s675_s2, 1024 }
   0x5   : > { %p535_p6 = scmp.ne.s32.totalorder %s675_s2, %s534_s23  ;;  %p541_p10 = scmp.lt.u32.totalorder %s534_s23, %s675_s2 }
   0x6   : > { %s680_s19 = scalar_select %p615_p2, 1, 0 }
   0x7   : > { %p501_p4 = pneg %p615_p2 }
   0x9   : > { %p624_p5 = pnand %p678_p3, %p501_p4 }
   0xb   : > { %p536_p7 = pneg %p624_p5 }
   0xd   : > { %p537_p8 = pnand %p536_p7, %p535_p6 }
   0xf   : > { %p538_p9 = pneg %p537_p8 }
  0x11   : > { %p543_p11 = pnand %p541_p10, %p538_p9 }
  0x13   : > { %546 = shalt.err (!%p543_p11)
}
  0x14   : > { %s547_s28 = scalar_lea.vmem %s153_s18, 1024  ;;  %p555_p1 = scmp.lt.s32.totalorder %s153_s18, %s153_s18 }
  0x15   : > { %p548_p12 = scmp.ne.s32.totalorder %s153_s18, %s547_s28  ;;  %p556_p4 = scmp.lt.s32.totalorder %s547_s28, %s547_s28 }
  0x17   : > { %p550_p13 = pnand %p548_p12, %p536_p7  ;;  %p557_p3 = por %p556_p4, %p555_p1 }
  0x19   : > { %p551_p0 = pneg %p550_p13 }
  0x1b   : > { %p558_p2 = pnand %p557_p3, %p551_p0 }
  0x1d   : > { %561 = shalt.err (!%p558_p2)
}
  0x1e   : > { %s575_s29 = smov 64   ;;  %s576_s30 = smov 4  }
  0x1f   : > { %504 = dma.hbm_to_vmem [thread:$0]  (!%p624_p5), %s675_s2, 1024, %s153_s18, [#allocation3], %s575_s29, %s575_s29, %s576_s30  }
  0x20   : > { %p682_p6 = scmp.ne.s32.totalorder %s680_s19, 0 }
  0x21   : > { %p683_p8 = scmp.eq.s32.totalorder (!%p682_p6), %s611_s16, 0 }
  0x22   : > { %185 = sbr.rel (%p682_p6) target bundleno = 651 (0x28b), region = 36 }
  0x29   : > { %567 = dma.done.wait (%p683_p8), [#allocation3], 1024   ;;  %p684_p7 = pmov %p683_p8 }
  0x2a   : > { %v577_v0 = vmov 0.0   ;;  %vm578_vm0 = vmmov 0   ;;  %v522_v1 = vld [vmem:[#allocation2] sm:$0xff]   ;;  %v523_v2 = vld [vmem:[#allocation2 + $0x8] sm:$0xff]   ;;  %v524_v3 = vld [vmem:[#allocation2 + $0x10] sm:$0xff]   ;;  %p212_p2 = scmp.lt.s32.totalorder %s611_s16, 1  ;;  %v347_v21 = vlaneseq }
  0x2b   : > { %569 = vsyncadd (%p684_p7), [#allocation3], 4294966272  ;;  %477 = vmatprep.subr.bf16.mxu0 %v577_v0  ;;  %493 = vmatprep.mubr.msk.bf16.mxu0 %vm578_vm0, %v577_v0  ;;  %v525_v4 = vld [vmem:[#allocation2 + $0x18] sm:$0xff]   ;;  %v526_v5 = vld [vmem:[#allocation2 + $0x20] sm:$0xff]   ;;  %v579_v10 = vmov 0   ;;  %s465_s20 = sshll.u32 %s611_s16, 3 }
  0x2c   : > { %478 = vmatpush3.bf16.xpose.msra.mxu0 %v522_v1  ;;  %v527_v6 = vld [vmem:[#allocation2 + $0x28] sm:$0xff]   ;;  %v528_v7 = vld [vmem:[#allocation2 + $0x30] sm:$0xff]   ;;  %s652_s7 = scalar_select %p212_p2, %s611_s16, 1  ;;  %v529_v8 = vld [vmem:[#allocation2 + $0x38] sm:$0xff]   ;;  %521 = vset.pattern.permute.xlu0 %v579_v10  ;;  %v348_v22 = vand.u32 127, %v347_v21  ;;  %v361_v28 = vshrl.u32 %v347_v21, 7  ;;  %v362_v29 = vstv %s465_s20 }
  0x2d   : > { %479 = vmatprep.subr.bf16.mxu0 %v577_v0  ;;  %v463_v11 = vld [vmem:[%s676_s3] ss:$0 sm:$0xff]  ;;  %vm373_vm3 = vcmask 0  }
  0x2e   : > { %s453_s8 = sshll.u32 %s652_s7, 2  ;;  %s454_s14 = sshll.u32 %s652_s7, 3  ;;  %v363_v31 = vadd.s32 %v362_v29, %v361_v28 }
  0x2f   : > { %s215_s11 = scalar_lea.vmem %s673_s0, %s453_s8  ;;  %s219_s19 = scalar_lea.vmem %s674_s1, %s454_s14 }
  0x30   : > { %v224_v9 = vld [vmem:[%s215_s11] sm:$0xf]  ;;  %vm364_vm2 = vcmp.lt.s32.totalorder %v363_v31, 12  ;;  %s222_s16 = scalar_lea.vmem %s677_s4, %s652_s7 }
  0x31   : > { %v349_v17 = vld [vmem:[%s219_s19] sm:$0xff] }
  0x34   : > { %480 = vmatpush3.bf16.xpose.msra.mxu0 %v523_v2 }
  0x35   : > { %481 = vmatprep.subr.bf16.mxu0 %v577_v0 }
  0x3c   : > { %482 = vmatpush3.bf16.xpose.msra.mxu0 %v524_v3 }
  0x3d   : > { %483 = vmatprep.subr.bf16.mxu0 %v577_v0 }
  0x44   : > { %484 = vmatpush3.bf16.xpose.msra.mxu0 %v525_v4 }
  0x45   : > { %485 = vmatprep.subr.bf16.mxu0 %v577_v0 }
  0x4c   : > { %486 = vmatpush3.bf16.xpose.msra.mxu0 %v526_v5 }
  0x4d   : > { %487 = vmatprep.subr.bf16.mxu0 %v577_v0 }
  0x54   : > { %488 = vmatpush3.bf16.xpose.msra.mxu0 %v527_v6 }
  0x55   : > { %489 = vmatprep.subr.bf16.mxu0 %v577_v0 }
  0x5c   : > { %490 = vmatpush3.bf16.xpose.msra.mxu0 %v528_v7 }
  0x5d   : > { %491 = vmatprep.subr.bf16.mxu0 %v577_v0 }
  0x64   : > { %492 = vmatpush3.bf16.xpose.msra.mxu0 %v529_v8 }
  0x6b   : > { %494 = vmatmul.mubr.bf16.vlgmr.msra.gmra.mrb[0].mxu0 %v224_v9 }
 0x13e   : > { %v323_v12 = vpop.f32.mrb[0].mxu0 }
 0x13f   : > { %v336_v13 = vsub.f32 %v323_v12, %v463_v11  ;;  %v495_v14 = vpop.f32.mrb[1].mxu0 }
 0x140   : > { %v326_v15 = vpop.f32.mrb[2].mxu0 }
 0x141   : > { %337 = vmax.xlane.f32.xlu0 %v336_v13  ;;  %v496_v16 = vpop.f32.mrb[3].mxu0 }
 0x157   : > { %351 = vperm.xlu0 %521, %v349_v17  }
 0x1ce   : > { %v338_v18 = vpop.xlane.xlu0 %337 }
 0x1cf   : > { %v339_v19 = vsub.f32 %v336_v13, %v338_v18 }
 0x1d1   : > { %v340_v20 = vmul.f32 1.442695, %v339_v19 }
 0x1d3   : > { %530 = vpow2.f32 %v340_v20 }
 0x1d6   : > { %v352_v23 = vpop.permute.xlu0 %351 }
 0x1d7   : > { %vm353_vm1 = vcmp.eq.s32.totalorder %v348_v22, %v352_v23 }
 0x1d8   : > { %v464_v25 = vsel %vm353_vm1, 1.0, %v577_v0 }
 0x1d9   : > { %v356_v26 = vmul.f32 %v464_v25, %v336_v13 }
 0x1dd   : > { %v531_v24 = vpop.eup %530 }
 0x1de   : > { %342 = vadd.xlane.f32.xlu1 %v531_v24 }
 0x1e2   : > { %357 = vadd.xlane.f32.xlu1 %v356_v26 }
 0x26b   : > { %v343_v27 = vpop.xlane.xlu1 %342 }
 0x26c   : > { %532 = vlog2.f32 %v343_v27 }
 0x26f   : > { %v358_v34 = vpop.xlane.xlu1 %357 }
 0x276   : > { %v533_v30 = vpop.eup %532 }
 0x277   : > { %v345_v32 = vmul.f32 0.6931472, %v533_v30 }
 0x279   : > { %v346_v33 = vadd.f32 %v345_v32, %v338_v18 }
 0x27b   : > { %v365_v35 = vsub.f32 %v346_v33, %v358_v34 }
 0x27d   : > { %v366_v36 = vsel %vm364_vm2, %v365_v35, 0.0 }
 0x27e   : > { %v367_v37 = vrot.slane %v366_v36, 4 }
 0x280   : > { %v368_v38 = vadd.f32 %v367_v37, %v366_v36 }
 0x282   : > { %v369_v39 = vrot.slane %v368_v38, 2 }
 0x284   : > { %v370_v40 = vadd.f32 %v369_v39, %v368_v38 }
 0x286   : > { %v371_v41 = vrot.slane %v370_v40, 1 }
 0x288   : > { %v372_v42 = vadd.f32 %v371_v41, %v370_v40 }
 0x28a   : > { %374 = vst.msk [vmem:[%s222_s16] sm:$0x1] %vm373_vm3, %v372_v42 }
 0x28b PF: > { %s15_s15 = sadd.s32 1, %s572_s15  }
 0x28c   : > { %p12_p3 = scmp.ge.s32.totalorder %s15_s15, 4  }
 0x28e   :  { %14 = sbr.rel (!%p12_p3) target bundleno = 1 (0x1), region = 74 }
 0x295   :  { %392 = vsyncpa [#allocation3], 1 }
 0x296   :  { %394 = vsyncpa [#allocation3 + $0x1], 1 }

</bundles_post_ra>
